<compile_context>
chip_gen: v5e
topology: v5e:2x2
jax: 0.10.0
libtpu: 0.0.40
codegen_flags: <defaults>
</compile_context>

<pallas_src>
import functools

import jax
import jax.numpy as jnp
from jax.experimental import pallas as pl
from jax.experimental.pallas import tpu as pltpu


# ---------------------------------------------------------------------------
# Tiling helpers (no degenerate tiles, no illegal partial blocks)
# ---------------------------------------------------------------------------
def _round_up(x: int, m: int) -> int:
    return (x + m - 1) // m * m


def _lane_tiling(dim: int, cap: int) -> tuple[int, int]:
    """Return (tile, padded_dim) for the minor (lane) axis.

    tile divides padded_dim and is either the full (unpadded) dim -- which is
    exempt from the /128 rule -- or a multiple of 128 chosen via cdiv so the
    zero padding stays < one tile.
    """
    if dim <= cap:
        return dim, dim
    p = _round_up(dim, 128)
    nb = -(-p // cap)                       # cdiv
    t = _round_up(-(-p // nb), 128)
    return t, t * nb


def _sublane_tiling(dim: int, mult: int, cap: int, want_split: bool) -> int:
    """Return a sublane tile that divides dim and is either a multiple of
    `mult` (dtype-aware sublane quantum) or the full dim.  If want_split,
    prefer >=2 blocks so the "parallel" grid axis can shard across the two
    v7x TensorCores."""
    if dim < mult or dim % mult != 0:
        return dim                          # full-dim block: exempt from /8 rule
    t = min(cap, dim)
    if want_split and dim // t < 2 and dim >= 2 * mult:
        t = (dim // 2) // mult * mult
    while dim % t != 0:                     # steps of `mult`, terminates at `mult`
        t -= mult
    return t


def _pad_last(x, new_last: int):
    if x.shape[-1] == new_last:
        return x
    pad = [(0, 0)] * (x.ndim - 1) + [(0, new_last - x.shape[-1])]
    return jnp.pad(x, pad)                  # zeros / False -> excluded by the mask


# ---------------------------------------------------------------------------
# Kernel 1: fused masked per-batch loss reduction (losses_with_mask hot path)
# ---------------------------------------------------------------------------
def _masked_loss_kernel(pmask_ref, imask_ref, *rest, num_losses):
    # refs: pmask (tb, ts), imask (tb, ts), K loss refs (tb, ts),
    #       K out refs (tb, 1) f32 (resident accumulators), den scratch (tb, 1)
    loss_refs = rest[:num_losses]
    out_refs = rest[num_losses:2 * num_losses]
    den_ref = rest[2 * num_losses]
    j = pl.program_id(1)

    @pl.when(j == 0)
    def _():
        den_ref[...] = jnp.zeros_like(den_ref)
        for o in out_refs:
            o[...] = jnp.zeros_like(o)

    pm = pmask_ref[...]
    im = imask_ref[...]
    if pm.dtype == jnp.bool_ and im.dtype == jnp.bool_:
        lm = (pm & im).astype(jnp.float32)          # one logical op + one cast
    else:
        lm = pm.astype(jnp.float32) * im.astype(jnp.float32)

    # keepdims reductions: stay in the natural (rows-on-sublane, 1 lane) layout
    den_ref[...] += jnp.sum(lm, axis=-1, keepdims=True)
    for lref, oref in zip(loss_refs, out_refs):
        oref[...] += jnp.sum(lm * lref[...].astype(jnp.float32),
                             axis=-1, keepdims=True)

    @pl.when(j == pl.num_programs(1) - 1)
    def _():
        # TODO(synk): mirrors reference semantics -- rows whose mask sums to 0
        #             produce NaN/Inf, exactly like the PyTorch division.
        for oref in out_refs:
            oref[...] = oref[...] / den_ref[...]


def masked_per_batch_losses(per_token_losses, padding_mask, input_ids_mask):
    """Fused `losses_with_mask` body.  Dict of (B, S) losses -> dict of (B,)."""
    keys = list(per_token_losses.keys())
    K = len(keys)
    B, S = padding_mask.shape

    # VMEM budget: (2 masks + K losses) * 2 buffers * tb * ts * 4B <= ~24 MiB
    tb0 = min(128, B)
    bytes_per_col = (2 + K) * 2 * tb0 * 4
    ts_cap = max(512, min(4096, (24 << 20) // bytes_per_col // 128 * 128))
    ts, s_pad = _lane_tiling(S, ts_cap)
    tb = _sublane_tiling(B, 8, 128, want_split=True)   # >=2 blocks on B for v7x

    pm = _pad_last(padding_mask, s_pad)
    im = _pad_last(input_ids_mask, s_pad)
    losses = [_pad_last(per_token_losses[k], s_pad) for k in keys]

    grid = (B // tb, s_pad // ts)                      # reduction axis (S) last
    tile_spec = pl.BlockSpec((tb, ts), lambda i, j: (i, j))

    outs = pl.pallas_call(
        functools.partial(_masked_loss_kernel, num_losses=K),
        out_shape=tuple(jax.ShapeDtypeStruct((B, 1), jnp.float32) for _ in keys),
        grid=grid,
        in_specs=[tile_spec, tile_spec] + [tile_spec] * K,
        # output block index depends only on i -> resident accumulator across j
        out_specs=tuple(pl.BlockSpec((tb, 1), lambda i, j: (i, 0)) for _ in keys),
        scratch_shapes=[pltpu.VMEM((tb, 1), jnp.float32)],
        compiler_params=pltpu.CompilerParams(
            dimension_semantics=("parallel", "arbitrary")),
    )(pm, im, *losses)
    return {k: outs[ki][:, 0] for ki, k in enumerate(keys)}


# ---------------------------------------------------------------------------
# Kernel 2: _interpolate_data_noise (with scale_t fused in)
# ---------------------------------------------------------------------------
def _interpolate_kernel(t_ref, x_ref, noise_ref, out_ref, *, inv_steps):
    # t_ref: (tb, 1) native integer timesteps ; x/noise/out: (tb, tc)
    t = t_ref[...].astype(jnp.float32) * inv_steps     # scale_t fused in-kernel
    x = x_ref[...].astype(jnp.float32)
    n = noise_ref[...].astype(jnp.float32)
    out_ref[...] = (x + (n - x) * t).astype(out_ref.dtype)


def interpolate_data_noise(x_start, t, noise, diffusion_steps):
    """x_t = x_start + (noise - x_start) * (t / diffusion_steps).  Returns (x_t, noise)."""
    B, S, H = x_start.shape
    SH = S * H
    # Lane-dense layout: fold (S, H) onto the lane axis (free row-major reshape).
    x2 = x_start.reshape(B, SH)
    n2 = noise.reshape(B, SH)
    t2 = t.reshape(B, 1)                   # tiny side-tile, rides along per row

    itemsize = jnp.dtype(x_start.dtype).itemsize
    sub_mult = max(8, 32 // itemsize)      # 8 f32 / 16 bf16 / 32 int8-fp8
    tb0 = min(256, B)
    # budget: 3 arrays * 2 buffers * tb * tc * 4B <= ~16 MiB (f32-safe, leaves
    # headroom for in-kernel f32 temporaries under the 32 MiB scoped default)
    tc_cap = max(512, min(4096, (16 << 20) // (6 * tb0 * 4) // 128 * 128))
    tc, sh_pad = _lane_tiling(SH, tc_cap)
    # only split B when the lane axis alone gives a single block (v7x sharding)
    tb = _sublane_tiling(B, sub_mult, 256, want_split=(sh_pad // tc) < 2)

    x2 = _pad_last(x2, sh_pad)
    n2 = _pad_last(n2, sh_pad)
    grid = (B // tb, sh_pad // tc)

    kern = functools.partial(_interpolate_kernel,
                             inv_steps=1.0 / float(diffusion_steps))
    out = pl.pallas_call(
        kern,
        out_shape=jax.ShapeDtypeStruct((B, sh_pad), x_start.dtype),
        grid=grid,
        in_specs=[
            pl.BlockSpec((tb, 1), lambda i, j: (i, 0)),
            pl.BlockSpec((tb, tc), lambda i, j: (i, j)),
            pl.BlockSpec((tb, tc), lambda i, j: (i, j)),
        ],
        out_specs=pl.BlockSpec((tb, tc), lambda i, j: (i, j)),
        compiler_params=pltpu.CompilerParams(
            dimension_semantics=("parallel", "parallel")),
    )(t2, x2, n2)
    if sh_pad != SH:
        out = out[:, :SH]
    return out.reshape(B, S, H), noise


# ---------------------------------------------------------------------------
# Criterion-like wrapper (forward == losses_with_mask)
# ---------------------------------------------------------------------------
class CriterionPallas:
    def __init__(self, diffusion_steps: int):
        self.diffusion_steps = diffusion_steps
        self.global_step = 0

    # compute_losses() is abstract in the reference; per-token losses come in.
    def losses_with_mask(self, per_token_losses, padding_mask, input_ids_mask):
        return masked_per_batch_losses(per_token_losses, padding_mask, input_ids_mask)

    def forward(self, per_token_losses, padding_mask, input_ids_mask):
        return self.losses_with_mask(per_token_losses, padding_mask, input_ids_mask)

    def scale_t(self, t):
        return t.astype(jnp.float32) * (1.0 / self.diffusion_steps)

    def _interpolate_data_noise(self, x_start, t, noise=None):
        if noise is None:
            noise = jax.random.normal(jax.random.PRNGKey(0), x_start.shape,
                                      x_start.dtype)
        return interpolate_data_noise(x_start, t, noise, self.diffusion_steps)


if __name__ == "__main__":
    B, S, H = 2, 8, 32
    diffusion_steps = 100

    key = jax.random.PRNGKey(0)
    k1, k2, k3, k4, k5 = jax.random.split(key, 5)
    x_start = jax.random.normal(k1, (B, S, H), jnp.float32)
    noise = jax.random.normal(k2, (B, S, H), jnp.float32)
    t = jax.random.randint(k3, (B,), 0, diffusion_steps)
    # masks keep their narrow native dtype (bool); cast happens inside the kernel
    padding_mask = jax.random.uniform(k4, (B, S)) > 0.2
    input_ids_mask = jax.random.uniform(k5, (B, S)) > 0.3
    # guarantee non-zero mask sums per batch row
    padding_mask = padding_mask.at[:, 0].set(True)
    input_ids_mask = input_ids_mask.at[:, 0].set(True)

    crit = CriterionPallas(diffusion_steps)

    # interpolation kernel (x_t = x_start + (noise - x_start) * t/steps)
    x_t, _ = crit._interpolate_data_noise(x_start, t, noise)
    x_t = jax.block_until_ready(x_t)

    # dummy per-token losses standing in for the abstract compute_losses()
    per_token_mse = jnp.mean((x_t - noise) ** 2, axis=-1)          # (B, S)
    per_token_mae = jnp.mean(jnp.abs(x_t - noise), axis=-1)        # (B, S)
    losses = crit.forward(
        {"mse": per_token_mse, "mae": per_token_mae}, padding_mask, input_ids_mask)
    losses = jax.block_until_ready(losses)

    # reference checks (plain JAX)
    t_s = (t.astype(jnp.float32) * (1.0 / diffusion_steps)).reshape(B, 1, 1)
    x_t_ref = x_start + (noise - x_start) * t_s
    lm = padding_mask.astype(jnp.float32) * input_ids_mask.astype(jnp.float32)
    mse_ref = (lm * per_token_mse).sum(-1) / lm.sum(-1)
    mae_ref = (lm * per_token_mae).sum(-1) / lm.sum(-1)

    assert x_t.dtype == x_start.dtype
    assert jnp.allclose(x_t, x_t_ref, atol=1e-5, rtol=1e-5)
    assert jnp.allclose(losses["mse"], mse_ref, atol=1e-5, rtol=1e-5)
    assert jnp.allclose(losses["mae"], mae_ref, atol=1e-5, rtol=1e-5)
    assert losses["mse"].shape == (B,)

    print("KERNEL_OK")
</pallas_src>

<mosaic_0001>
module attributes {stable_mosaic.version = 11 : i64} {
  func.func @_interpolate_kernel(%arg0: i32, %arg1: i32, %arg2: memref<2x1xi32, #tpu.memory_space<vmem>>, %arg3: memref<2x256xf32, #tpu.memory_space<vmem>>, %arg4: memref<2x256xf32, #tpu.memory_space<vmem>>, %arg5: memref<2x256xf32, #tpu.memory_space<vmem>>) attributes {dimension_semantics = [#tpu.dimension_semantics<parallel>, #tpu.dimension_semantics<parallel>], iteration_bounds = array<i64: 1, 1>, scalar_prefetch = 0 : i64, scratch_operands = 0 : i64, tpu.core_type = #tpu.core_type<tc>, window_params = [{transform_indices = @transform_0, window_bounds = array<i64: 2, 1>}, {transform_indices = @transform_1, window_bounds = array<i64: 2, 256>}, {transform_indices = @transform_2, window_bounds = array<i64: 2, 256>}, {transform_indices = @transform_3, window_bounds = array<i64: 2, 256>}]} {
    %c0 = arith.constant 0 : index
    %c0_0 = arith.constant 0 : index
    %0 = vector.load %arg2[%c0, %c0_0] : memref<2x1xi32, #tpu.memory_space<vmem>>, vector<2x1xi32>
    %1 = arith.sitofp %0 : vector<2x1xi32> to vector<2x1xf32>
    %cst = arith.constant 0.00999999977 : f32
    %2 = vector.broadcast %cst : f32 to vector<2x1xf32>
    %3 = arith.mulf %1, %2 : vector<2x1xf32>
    %c0_1 = arith.constant 0 : index
    %c0_2 = arith.constant 0 : index
    %4 = vector.load %arg3[%c0_1, %c0_2] : memref<2x256xf32, #tpu.memory_space<vmem>>, vector<2x256xf32>
    %c0_3 = arith.constant 0 : index
    %c0_4 = arith.constant 0 : index
    %5 = vector.load %arg4[%c0_3, %c0_4] : memref<2x256xf32, #tpu.memory_space<vmem>>, vector<2x256xf32>
    %6 = arith.subf %5, %4 : vector<2x256xf32>
    %7 = vector.broadcast %3 : vector<2x1xf32> to vector<2x256xf32>
    %8 = arith.mulf %6, %7 : vector<2x256xf32>
    %9 = arith.addf %4, %8 : vector<2x256xf32>
    %c0_5 = arith.constant 0 : index
    %c0_6 = arith.constant 0 : index
    %10 = vector.load %arg5[%c0_5, %c0_6] : memref<2x256xf32, #tpu.memory_space<vmem>>, vector<2x256xf32>
    tpu.vector_store %arg5[%c0_5, %c0_6], %9 {strides = array<i32>} : memref<2x256xf32, #tpu.memory_space<vmem>>, vector<2x256xf32>,
    return
  }
  func.func @transform_0(%arg0: i32, %arg1: i32) -> (i32, i32) {
    %c0_i32 = arith.constant 0 : i32
    %c0_i32_0 = arith.constant 0 : i32
    return %arg0, %c0_i32 : i32, i32
  }
  func.func @transform_1(%arg0: i32, %arg1: i32) -> (i32, i32) {
    %c0_i32 = arith.constant 0 : i32
    return %arg0, %arg1 : i32, i32
  }
  func.func @transform_2(%arg0: i32, %arg1: i32) -> (i32, i32) {
    %c0_i32 = arith.constant 0 : i32
    return %arg0, %arg1 : i32, i32
  }
  func.func @transform_3(%arg0: i32, %arg1: i32) -> (i32, i32) {
    %c0_i32 = arith.constant 0 : i32
    return %arg0, %arg1 : i32, i32
  }
}

</mosaic_0001>

<bundles_post_ra>
// kernel: tpu_custom_call.1
= control target key start
LH: loop header
LB: loop body
LE: loop exit
PB: predicated region body
PF: predicated region fallthrough
CT: control target
= control target key end

     0   :  { %8 = vsyncpa [#allocation3], 0  ;;  %s157_s0 = inlined_call_operand.vmem [shape: s32[2,1], index: 0, kind: input, shape index: {}]   ;;  %s158_s1 = inlined_call_operand.hbm [shape: f32[2,256], index: 1, kind: input, shape index: {}]   ;;  %s159_s2 = inlined_call_operand.vmem [shape: f32[2,256], index: 2, kind: input, shape index: {}]   ;;  %s160_s3 = inlined_call_operand.hbm [shape: f32[2,256], index: 3, kind: output, shape index: {}]  }
   0x1   :  { %9 = vsyncpa [#allocation4], 0  ;;  %s17_s14 = sshll.u32 %s158_s1, 4  ;;  %s121_s15 = smov [#allocation2]   ;;  %s18_s14 = int_to_ptr.hbm [resolvable:$true] %s17_s14 }
   0x2   :  { %s19_s16 = sshll.u32 %s121_s15, 4  ;;  %s20_s16 = int_to_ptr.vmem [resolvable:$true] %s19_s16 }
   0x3   :  { %22 = dma.hbm_to_vmem [thread:$0]  %s18_s14, 64, %s20_s16, [#allocation3]  }
   0x4   :  { %117 = dma.done.wait [#allocation3], 64  }
   0x5   :  { %118 = vsyncadd [#allocation3], 4294967232  ;;  %v122_v0 = vmov 0   ;;  %v29_v1 = vld [vmem:[%s157_s0] sm:$0x3]  ;;  %s124_s20 = smov [#allocation5]  }
   0x6   :  { %68 = vset.pattern.permute.xlu0 %v122_v0  ;;  %v30_v2 = vcvt.s32.f32 %v29_v1  ;;  %v123_v4 = vmov 269488144   ;;  %v32_v6 = vld [vmem:[#allocation2] sm:$0xf]  ;;  %s52_s21 = sshll.u32 %s124_s20, 4  ;;  %s54_s0 = sshll.u32 %s160_s3, 4  ;;  %s53_s21 = int_to_ptr.vmem [resolvable:$true] %s52_s21  ;;  %s55_s0 = int_to_ptr.hbm [resolvable:$true] %s54_s0 }
   0x7   :  { %v40_v5 = vunpack.c.l.s4 %v123_v4  ;;  %v33_v7 = vld [vmem:[%s159_s2] sm:$0xf] }
   0x8   :  { %v31_v3 = vmul.f32 0.01, %v30_v2  ;;  %v34_v9 = vsub.f32 %v33_v7, %v32_v6 }
   0x9   :  { %v41_v8 = vunpack.c.0.s8 %v40_v5 }
   0xa   :  { %37 = vperm.xlu0 %68, %v31_v3  }
  0x7c   :  { %v38_v10 = vpop.permute.xlu0 %37 }
  0x7d   :  { %v42_v11 = vperm.slane %v38_v10, %v41_v8 }
  0x7f   :  { %v44_v12 = vmul.f32 %v42_v11, %v34_v9 }
  0x81   :  { %v45_v13 = vadd.f32 %v44_v12, %v32_v6 }
  0x83   :  { %46 = vst [vmem:[#allocation5] sm:$0xf] %v45_v13 }
  0x84   :  { %57 = dma.vmem_to_hbm [thread:$0]  %s53_s21, 64, %s55_s0, [#allocation4]  }
  0x85   :  { %119 = dma.done.wait [#allocation4], 64  }
  0x86   :  { %120 = vsyncadd [#allocation4], 4294967232 }
  0x87   :  { %62 = vsyncpa [#allocation3], 1 }
  0x88   :  { %63 = vsyncpa [#allocation4], 1 }

</bundles_post_ra>
